<compile_context>
chip_gen: v5e
topology: v5e:2x2
jax: 0.10.0
libtpu: 0.0.40
codegen_flags: <defaults>
</compile_context>

<pallas_src>
import functools

import jax
import jax.numpy as jnp
from jax.experimental import pallas as pl
from jax.experimental.pallas import tpu as pltpu

MXU_DTYPE = jnp.bfloat16   # matmul operand dtype (accumulation is always f32)


def _recon_block_kernel(x_ref, wb_ref, a_ref, o_ref, cur_ref, res_ref, *, H):
    # x_ref  : (R, L) f32 VMEM, R = N*H rows, L = W*C lanes (lane-dense).
    #          Same block index every grid step -> DMA'd once, stays resident.
    # wb_ref : (1, 3L, L) MXU_DTYPE VMEM, banded weights for the CURRENT layer
    #          only (pipelined per grid step).
    # a_ref  : (9,) f32 SMEM, PReLU slopes for relu2..relu16 (+ dummy for l=8).
    # o_ref  : (R, L) f32 VMEM, same block index every step (written at l=8).
    # cur/res: (R, L) f32 VMEM scratch, persistent across grid steps.
    l = pl.program_id(0)
    R, L = x_ref.shape

    @pl.when(l == 0)
    def _():
        cur_ref[...] = x_ref[...]     # chain state
        res_ref[...] = x_ref[...]     # res1

    cur = cur_ref[...]

    # Per-image row-boundary masks: zero the roll wraparound rows and the rows
    # that would leak across image boundaries in the stacked N*H row dim.
    # Cheap VPU filler under the matmul (iota + mod + cmp, once per step).
    y = jax.lax.broadcasted_iota(jnp.int32, (R, L), 0) % H
    not_top = (y != 0).astype(jnp.float32)        # row y-1 exists
    not_bot = (y != H - 1).astype(jnp.float32)    # row y+1 exists

    # H-direction taps via XLU roll (free slot) + masks; no pad scratch.
    up = pltpu.roll(cur, shift=1, axis=0) * not_top        # input row y-1
    dn = pltpu.roll(cur, shift=R - 1, axis=0) * not_bot    # input row y+1

    # 3x3 SAME conv as a single (R, 3L) x (3L, L) MXU matmul (K = 3L):
    # the W taps / edge padding are already folded into the banded weights.
    lhs = jnp.concatenate([up, cur, dn], axis=1).astype(MXU_DTYPE)
    acc = jnp.dot(lhs, wb_ref[0], preferred_element_type=jnp.float32)

    # PReLU (slope table padded so the l == 8 read is in-bounds; unused there).
    a = a_ref[l]
    t = jnp.where(acc >= 0.0, acc, a * acc)

    is_last = l == 8
    is_odd = (l % 2) == 1          # layers 1,3,5,7 close a residual block

    @pl.when(jnp.logical_and(jnp.logical_not(is_last), jnp.logical_not(is_odd)))
    def _():                        # l in {0,2,4,6}: conv -> prelu
        cur_ref[...] = t

    @pl.when(is_odd)
    def _():                        # l in {1,3,5,7}: conv -> prelu -> +res
        t2 = t + res_ref[...]
        cur_ref[...] = t2
        res_ref[...] = t2

    @pl.when(is_last)
    def _():                        # l == 8: conv17 + res1 (re-read x here)
        o_ref[...] = (acc + x_ref[...]).astype(o_ref.dtype)


def _banded_weights(w_hwio, W, C, dtype):
    """w_hwio: (9, 3, 3, C, C) [layer, kh, kw, in, out] -> (9, 3*W*C, W*C).

    wb[l, dy*L + xi*C + ci, xo*C + co] = w[l, dy, xi - xo + 1, ci, co] when
    |xi - xo| <= 1, else 0.  Folds the W-direction taps and the zero padding
    at the left/right image edges into the matmul K dimension; the 3 dy taps
    are stacked along K so each conv is a single K=3L matmul.
    """
    L = W * C
    xi = jnp.arange(W)[None, :, None]
    xo = jnp.arange(W)[None, None, :]
    dx = jnp.arange(3)[:, None, None] - 1
    band = (xi - xo == dx).astype(w_hwio.dtype)                # (3, W, W)
    wb = jnp.einsum("xab,ldxio->ldaibo", band, w_hwio)         # (9,3,W,C,W,C)
    return wb.reshape(9, 3 * L, L).astype(dtype)


def recon_block(x_nhwc, w_stack, alphas):
    """x_nhwc: (N,H,W,C) f32; w_stack: (9,3,3,C,C) HWIO; alphas: (8,) f32."""
    N, H, W, C = x_nhwc.shape
    R, L = N * H, W * C
    wb = _banded_weights(w_stack, W, C, MXU_DTYPE)             # (9, 3L, L)
    x2d = x_nhwc.reshape(R, L)                                 # lane-dense
    # Pad the PReLU slope table so the kernel's unconditional a_ref[l] read is
    # always in-bounds (layer 8 has no PReLU; the dummy value is never used).
    alphas9 = jnp.concatenate(
        [alphas.astype(jnp.float32), jnp.zeros((1,), jnp.float32)])

    flops = 9 * 2 * R * (3 * L) * L
    bytes_accessed = x2d.size * 4 + wb.size * 2 + R * L * 4

    out2d = pl.pallas_call(
        functools.partial(_recon_block_kernel, H=H),
        out_shape=jax.ShapeDtypeStruct((R, L), x_nhwc.dtype),
        grid_spec=pltpu.PrefetchScalarGridSpec(
            num_scalar_prefetch=0,
            grid=(9,),                                          # serial layer chain
            in_specs=[
                # Input block: same index every step -> resident, DMA'd once.
                pl.BlockSpec((R, L), lambda l: (0, 0)),
                # One layer's banded weights per step -> DMA pipelined.
                pl.BlockSpec((1, 3 * L, L), lambda l: (l, 0, 0)),
                # PReLU slopes in SMEM (scalar reads).
                pl.BlockSpec(memory_space=pltpu.MemorySpace.SMEM),
            ],
            # Output revisited every step; written only at the last step.
            out_specs=pl.BlockSpec((R, L), lambda l: (0, 0)),
            scratch_shapes=[
                pltpu.VMEM((R, L), jnp.float32),   # cur (carried across steps)
                pltpu.VMEM((R, L), jnp.float32),   # res (carried across steps)
            ],
        ),
        compiler_params=pltpu.CompilerParams(
            dimension_semantics=("arbitrary",),
            vmem_limit_bytes=32 * 1024 * 1024,
        ),
        cost_estimate=pl.CostEstimate(
            flops=flops, transcendentals=0, bytes_accessed=bytes_accessed),
    )(x2d, wb, alphas9)
    return out2d.reshape(N, H, W, C)


def recon_block_ref(x, w_stack, alphas):
    """Pure-JAX reference (XLA convs), same NHWC/HWIO convention."""
    def conv(v, w):
        return jax.lax.conv_general_dilated(
            v, w, window_strides=(1, 1), padding="SAME",
            dimension_numbers=("NHWC", "HWIO", "NHWC"))

    def prelu(v, a):
        return jnp.where(v >= 0, v, a * v)

    cur = x
    for blk in range(4):
        res = cur
        t = prelu(conv(cur, w_stack[2 * blk]), alphas[2 * blk])
        t = prelu(conv(t, w_stack[2 * blk + 1]), alphas[2 * blk + 1])
        cur = t + res
    return conv(cur, w_stack[8]) + x


if __name__ == "__main__":
    key = jax.random.PRNGKey(0)
    N, C, H, W = 2, 16, 16, 16              # PyTorch NCHW shape: (2, 16, 16, 16)
    kx, kw = jax.random.split(key)

    # Input (built NCHW like PyTorch, then converted to kernel layout NHWC).
    x_nchw = jax.random.normal(kx, (N, C, H, W), jnp.float32)
    x = jnp.transpose(x_nchw, (0, 2, 3, 1))

    # 9 conv weights, deterministic init. PyTorch shape (O, I, 3, 3) -> HWIO.
    w_oihw = 0.05 * jax.random.normal(kw, (9, C, C, 3, 3), jnp.float32)
    w_stack = jnp.transpose(w_oihw, (0, 3, 4, 2, 1))   # (9, kh, kw, I, O)

    # 8 PReLU slopes (nn.PReLU() default init = 0.25, single shared param).
    alphas = jnp.full((8,), 0.25, jnp.float32)

    out = jax.block_until_ready(jax.jit(recon_block)(x, w_stack, alphas))
    ref = recon_block_ref(x, w_stack, alphas)

    assert out.shape == (N, H, W, C)
    max_err = float(jnp.max(jnp.abs(out - ref)))
    mean_err = float(jnp.mean(jnp.abs(out - ref)))
    # bf16 MXU operands vs. a pure-f32 XLA reference => looser max-abs bound.
    tol = 2e-3 if MXU_DTYPE == jnp.float32 else 1e-1
    if not (max_err <= tol):
        raise AssertionError(
            f"mismatch vs reference: max abs err = {max_err}, mean = {mean_err}")
    print("KERNEL_OK")
</pallas_src>

<mosaic_0001>
module attributes {stable_mosaic.version = 11 : i64} {
  func.func @_recon_block_kernel(%arg0: i32, %arg1: memref<32x256xf32, #tpu.memory_space<vmem>>, %arg2: memref<1x768x256xbf16, #tpu.memory_space<vmem>>, %arg3: memref<9xf32, #tpu.memory_space<smem>>, %arg4: memref<32x256xf32, #tpu.memory_space<vmem>>, %arg5: memref<32x256xf32, #tpu.memory_space<vmem>>, %arg6: memref<32x256xf32, #tpu.memory_space<vmem>>) attributes {dimension_semantics = [#tpu.dimension_semantics<arbitrary>], iteration_bounds = array<i64: 9>, scalar_prefetch = 0 : i64, scratch_operands = 2 : i64, tpu.core_type = #tpu.core_type<tc>, window_params = [{pipeline_mode = #tpu.pipeline_mode<synchronous>, transform_indices = @transform_0, window_bounds = array<i64: 32, 256>}, {transform_indices = @transform_1, window_bounds = array<i64: 1, 768, 256>}, {transform_indices = @transform_2, window_bounds = array<i64: 9>}, {pipeline_mode = #tpu.pipeline_mode<synchronous>, transform_indices = @transform_3, window_bounds = array<i64: 32, 256>}]} {
    %c0_i32 = arith.constant 0 : i32
    %0 = arith.cmpi eq, %arg0, %c0_i32 : i32
    %1 = arith.extui %0 : i1 to i32
    %c0_i32_0 = arith.constant 0 : i32
    %2 = arith.cmpi ne, %1, %c0_i32_0 : i32
    scf.if %2 {
      %c0_22 = arith.constant 0 : index
      %c0_23 = arith.constant 0 : index
      %66 = vector.load %arg1[%c0_22, %c0_23] : memref<32x256xf32, #tpu.memory_space<vmem>>, vector<32x256xf32>
      %c0_24 = arith.constant 0 : index
      %c0_25 = arith.constant 0 : index
      %67 = vector.load %arg5[%c0_24, %c0_25] : memref<32x256xf32, #tpu.memory_space<vmem>>, vector<32x256xf32>
      tpu.vector_store %arg5[%c0_24, %c0_25], %66 {strides = array<i32>} : memref<32x256xf32, #tpu.memory_space<vmem>>, vector<32x256xf32>,
      %c0_26 = arith.constant 0 : index
      %c0_27 = arith.constant 0 : index
      %68 = vector.load %arg1[%c0_26, %c0_27] : memref<32x256xf32, #tpu.memory_space<vmem>>, vector<32x256xf32>
      %c0_28 = arith.constant 0 : index
      %c0_29 = arith.constant 0 : index
      %69 = vector.load %arg6[%c0_28, %c0_29] : memref<32x256xf32, #tpu.memory_space<vmem>>, vector<32x256xf32>
      tpu.vector_store %arg6[%c0_28, %c0_29], %68 {strides = array<i32>} : memref<32x256xf32, #tpu.memory_space<vmem>>, vector<32x256xf32>,
    } else {
    }
    %c0 = arith.constant 0 : index
    %c0_1 = arith.constant 0 : index
    %3 = vector.load %arg5[%c0, %c0_1] : memref<32x256xf32, #tpu.memory_space<vmem>>, vector<32x256xf32>
    %4 = tpu.iota {dimensions = array<i32: 0>} : vector<32x256xi32>
    %c16_i32 = arith.constant 16 : i32
    %c0_i32_2 = arith.constant 0 : i32
    %5 = arith.cmpi eq, %c16_i32, %c0_i32_2 : i32
    %c1_i32 = arith.constant 1 : i32
    %6 = arith.select %5, %c1_i32, %c16_i32 : i32
    %7 = vector.broadcast %6 : i32 to vector<32x256xi32>
    %8 = arith.remsi %4, %7 : vector<32x256xi32>
    %c0_i32_3 = arith.constant 0 : i32
    %9 = vector.broadcast %c0_i32_3 : i32 to vector<32x256xi32>
    %10 = arith.cmpi ne, %8, %9 : vector<32x256xi32>
    %c0_i32_4 = arith.constant 0 : i32
    %11 = vector.broadcast %c0_i32_4 : i32 to vector<32x256xi32>
    %12 = arith.cmpi slt, %8, %11 : vector<32x256xi32>
    %c0_i32_5 = arith.constant 0 : i32
    %13 = arith.cmpi slt, %6, %c0_i32_5 : i32
    %14 = vector.broadcast %13 : i1 to vector<32x256xi1>
    %15 = vector.broadcast %14 : vector<32x256xi1> to vector<32x256xi1>
    %16 = arith.xori %12, %15 : vector<32x256xi1>
    %17 = arith.andi %16, %10 : vector<32x256xi1>
    %18 = vector.broadcast %6 : i32 to vector<32x256xi32>
    %19 = arith.addi %8, %18 : vector<32x256xi32>
    %20 = arith.select %17, %19, %8 : vector<32x256xi1>, vector<32x256xi32>
    %c0_i32_6 = arith.constant 0 : i32
    %21 = vector.broadcast %c0_i32_6 : i32 to vector<32x256xi32>
    %22 = arith.cmpi ne, %20, %21 : vector<32x256xi32>
    %23 = arith.extui %22 : vector<32x256xi1> to vector<32x256xi32>
    %24 = arith.sitofp %23 : vector<32x256xi32> to vector<32x256xf32>
    %c15_i32 = arith.constant 15 : i32
    %25 = vector.broadcast %c15_i32 : i32 to vector<32x256xi32>
    %26 = arith.cmpi ne, %20, %25 : vector<32x256xi32>
    %27 = arith.extui %26 : vector<32x256xi1> to vector<32x256xi32>
    %28 = arith.sitofp %27 : vector<32x256xi32> to vector<32x256xf32>
    %c1_i32_7 = arith.constant 1 : i32
    %29 = tpu.dynamic_rotate %3 by %c1_i32_7 dim 0 : vector<32x256xf32>, i32 -> vector<32x256xf32>
    %30 = arith.mulf %29, %24 : vector<32x256xf32>
    %c31_i32 = arith.constant 31 : i32
    %31 = tpu.dynamic_rotate %3 by %c31_i32 dim 0 : vector<32x256xf32>, i32 -> vector<32x256xf32>
    %32 = arith.mulf %31, %28 : vector<32x256xf32>
    %33 = tpu.concatenate %30, %3, %32 in 1 : vector<32x256xf32>, vector<32x256xf32>, vector<32x256xf32> -> vector<32x768xf32>
    %34 = arith.truncf %33 : vector<32x768xf32> to vector<32x768xbf16>
    %c0_8 = arith.constant 0 : index
    %c0_9 = arith.constant 0 : index
    %c0_10 = arith.constant 0 : index
    %35 = vector.load %arg2[%c0_8, %c0_9, %c0_10] : memref<1x768x256xbf16, #tpu.memory_space<vmem>>, vector<1x768x256xbf16>
    %36 = vector.shape_cast %35 : vector<1x768x256xbf16> to vector<768x256xbf16>
    %cst = arith.constant dense<0.000000e+00> : vector<32x256xf32>
    %37 = tpu.matmul %34, %36, %cst {dimension_numbers = #tpu.dot_dimension_numbers<[1], [0], [0], [1], [0, 0, 1, 1], [], []>} : vector<32x768xbf16>, vector<768x256xbf16>, vector<32x256xf32> -> vector<32x256xf32>
    %38 = arith.index_cast %arg0 : i32 to index
    %39 = memref.load %arg3[%38] : memref<9xf32, #tpu.memory_space<smem>>
    %cst_11 = arith.constant 0.000000e+00 : f32
    %40 = vector.broadcast %cst_11 : f32 to vector<32x256xf32>
    %41 = arith.cmpf oge, %37, %40 : vector<32x256xf32>
    %42 = vector.broadcast %39 : f32 to vector<32x256xf32>
    %43 = arith.mulf %42, %37 : vector<32x256xf32>
    %44 = arith.select %41, %37, %43 : vector<32x256xi1>, vector<32x256xf32>
    %c8_i32 = arith.constant 8 : i32
    %45 = arith.cmpi eq, %arg0, %c8_i32 : i32
    %c2_i32 = arith.constant 2 : i32
    %c0_i32_12 = arith.constant 0 : i32
    %46 = arith.cmpi eq, %c2_i32, %c0_i32_12 : i32
    %c1_i32_13 = arith.constant 1 : i32
    %47 = arith.select %46, %c1_i32_13, %c2_i32 : i32
    %48 = arith.remsi %arg0, %47 : i32
    %c0_i32_14 = arith.constant 0 : i32
    %49 = arith.cmpi ne, %48, %c0_i32_14 : i32
    %c0_i32_15 = arith.constant 0 : i32
    %50 = arith.cmpi slt, %48, %c0_i32_15 : i32
    %c0_i32_16 = arith.constant 0 : i32
    %51 = arith.cmpi slt, %47, %c0_i32_16 : i32
    %52 = arith.xori %50, %51 : i1
    %53 = arith.andi %52, %49 : i1
    %54 = arith.addi %48, %47 : i32
    %55 = arith.select %53, %54, %48 : i32
    %c1_i32_17 = arith.constant 1 : i32
    %56 = arith.cmpi eq, %55, %c1_i32_17 : i32
    %true = arith.constant true
    %57 = arith.xori %45, %true : i1
    %true_18 = arith.constant true
    %58 = arith.xori %56, %true_18 : i1
    %59 = arith.andi %57, %58 : i1
    %60 = arith.extui %59 : i1 to i32
    %c0_i32_19 = arith.constant 0 : i32
    %61 = arith.cmpi ne, %60, %c0_i32_19 : i32
    scf.if %61 {
      %c0_22 = arith.constant 0 : index
      %c0_23 = arith.constant 0 : index
      %66 = vector.load %arg5[%c0_22, %c0_23] : memref<32x256xf32, #tpu.memory_space<vmem>>, vector<32x256xf32>
      tpu.vector_store %arg5[%c0_22, %c0_23], %44 {strides = array<i32>} : memref<32x256xf32, #tpu.memory_space<vmem>>, vector<32x256xf32>,
    } else {
    }
    %62 = arith.extui %56 : i1 to i32
    %c0_i32_20 = arith.constant 0 : i32
    %63 = arith.cmpi ne, %62, %c0_i32_20 : i32
    scf.if %63 {
      %c0_22 = arith.constant 0 : index
      %c0_23 = arith.constant 0 : index
      %66 = vector.load %arg6[%c0_22, %c0_23] : memref<32x256xf32, #tpu.memory_space<vmem>>, vector<32x256xf32>
      %67 = arith.addf %44, %66 : vector<32x256xf32>
      %c0_24 = arith.constant 0 : index
      %c0_25 = arith.constant 0 : index
      %68 = vector.load %arg5[%c0_24, %c0_25] : memref<32x256xf32, #tpu.memory_space<vmem>>, vector<32x256xf32>
      tpu.vector_store %arg5[%c0_24, %c0_25], %67 {strides = array<i32>} : memref<32x256xf32, #tpu.memory_space<vmem>>, vector<32x256xf32>,
      %c0_26 = arith.constant 0 : index
      %c0_27 = arith.constant 0 : index
      %69 = vector.load %arg6[%c0_26, %c0_27] : memref<32x256xf32, #tpu.memory_space<vmem>>, vector<32x256xf32>
      tpu.vector_store %arg6[%c0_26, %c0_27], %67 {strides = array<i32>} : memref<32x256xf32, #tpu.memory_space<vmem>>, vector<32x256xf32>,
    } else {
    }
    %64 = arith.extui %45 : i1 to i32
    %c0_i32_21 = arith.constant 0 : i32
    %65 = arith.cmpi ne, %64, %c0_i32_21 : i32
    scf.if %65 {
      %c0_22 = arith.constant 0 : index
      %c0_23 = arith.constant 0 : index
      %66 = vector.load %arg1[%c0_22, %c0_23] : memref<32x256xf32, #tpu.memory_space<vmem>>, vector<32x256xf32>
      %67 = arith.addf %37, %66 : vector<32x256xf32>
      %c0_24 = arith.constant 0 : index
      %c0_25 = arith.constant 0 : index
      %68 = vector.load %arg4[%c0_24, %c0_25] : memref<32x256xf32, #tpu.memory_space<vmem>>, vector<32x256xf32>
      tpu.vector_store %arg4[%c0_24, %c0_25], %67 {strides = array<i32>} : memref<32x256xf32, #tpu.memory_space<vmem>>, vector<32x256xf32>,
    } else {
    }
    return
  }
  func.func @transform_0(%arg0: i32) -> (i32, i32) {
    %c0_i32 = arith.constant 0 : i32
    %c0_i32_0 = arith.constant 0 : i32
    %c0_i32_1 = arith.constant 0 : i32
    return %c0_i32, %c0_i32_0 : i32, i32
  }
  func.func @transform_1(%arg0: i32) -> (i32, i32, i32) {
    %c0_i32 = arith.constant 0 : i32
    %c0_i32_0 = arith.constant 0 : i32
    %c0_i32_1 = arith.constant 0 : i32
    return %arg0, %c0_i32, %c0_i32_0 : i32, i32, i32
  }
  func.func @transform_2(%arg0: i32) -> i32 {
    %c0_i32 = arith.constant 0 : i32
    %c0_i32_0 = arith.constant 0 : i32
    return %c0_i32 : i32
  }
  func.func @transform_3(%arg0: i32) -> (i32, i32) {
    %c0_i32 = arith.constant 0 : i32
    %c0_i32_0 = arith.constant 0 : i32
    %c0_i32_1 = arith.constant 0 : i32
    return %c0_i32, %c0_i32_0 : i32, i32
  }
}

</mosaic_0001>

<bundles_post_ra>
// kernel: recon_block.1
= control target key start
LH: loop header
LB: loop body
LE: loop exit
PB: predicated region body
PF: predicated region fallthrough
CT: control target
= control target key end

     0   :  { %8 = vsyncpa [#allocation5], 0  ;;  %s1882_s12 = smov 0   ;;  %s2425_s0 = inlined_call_operand.vmem [shape: f32[32,256], index: 0, kind: input, shape index: {}]   ;;  %s2426_s1 = inlined_call_operand.vmem [shape: bf16[9,768,256], index: 1, kind: input, shape index: {}]   ;;  %s2427_s2 = inlined_call_operand.vmem [shape: f32[9], index: 2, kind: input, shape index: {}]   ;;  %s2428_s3 = inlined_call_operand.vmem [shape: f32[32,256], index: 3, kind: output, shape index: {}]  }
   0x1 LB: > { %s1888_s13 = sadd.s32 4294967295, %s1858_s12   ;;  %p1314_p0 = scmp.ge.s32.totalorder %s1858_s12, 1  ;;  %s1858_s12 = sphi %s1882_s12, %s14_s12  }
   0x2   : > { %p108_p1 = scmp.lt.s32.totalorder %s1858_s12, 10  ;;  %p1315_p2 = scmp.ne.s32.totalorder %s1888_s13, 0 }
   0x3   : > { %s123_s16 = sshll.u32 %s2427_s2, 4  ;;  %p1821_p4 = scmp.eq.s32.totalorder %s1888_s13, 0  ;;  %s124_s16 = int_to_ptr.vmem [resolvable:$true] %s123_s16 }
   0x4   : > { %p109_p3 = pnand %p1314_p0, %p108_p1  ;;  %s1860_s17 = smov [#allocation4]  }
   0x6   : > { %p1817_p5 = pneg %p109_p3  ;;  %144 = sbr.rel (%p109_p3) target bundleno = 350 (0x15e), region = 32 }
   0x8   : > { %p1818_p6 = pnand %p1821_p4, %p1817_p5 }
   0xa   : > { %1820 = dma.vmem_to_smem (!%p1818_p6), %s124_s16, 16, %s1860_s17, [#allocation5]  }
   0xb   : > { %1853 = dma.done.wait (%p1821_p4), [#allocation5], 16  }
   0xc   : > { %1855 = vsyncadd (%p1821_p4), [#allocation5], 4294967280 }
   0xd   : > { %151 = sfence }
   0xe   : > { %p165_p7 = scmp.lt.s32.totalorder %s1888_s13, 8 }
  0x10   : > { %s166_s18 = scalar_select %p165_p7, %s1888_s13, 8 }
  0x11   : > { %173 = sbr.rel (%p1315_p2) target bundleno = 39 (0x27), region = 40 }
  0x12   : > { %s1812_s19 = smul.u32 768, %s166_s18 }
  0x14   : > { %s1902_s22 = scalar_lea.vmem %s2426_s1, %s1812_s19 }
  0x16   : > { %v174_v0 = vld [vmem:[%s2425_s0] sm:$0xff]  ;;  %v175_v1 = vld [vmem:[%s2425_s0 + $0x8] sm:$0xff]  ;;  %v176_v2 = vld [vmem:[%s2425_s0 + $0x10] sm:$0xff] }
  0x17   : > { %182 = vst [vmem:[#allocation2 + $0x30] sm:$0xff] %v174_v0  ;;  %v177_v3 = vld [vmem:[%s2425_s0 + $0x18] sm:$0xff]  ;;  %v178_v4 = vld [vmem:[%s2425_s0 + $0x20] sm:$0xff]  ;;  %v179_v5 = vld [vmem:[%s2425_s0 + $0x28] sm:$0xff] }
  0x18   : > { %183 = vst [vmem:[#allocation2] sm:$0xff] %v175_v1  ;;  %v180_v6 = vld [vmem:[%s2425_s0 + $0x30] sm:$0xff]  ;;  %v181_v7 = vld [vmem:[%s2425_s0 + $0x38] sm:$0xff] }
  0x19   : > { %184 = vst [vmem:[#allocation2 + $0x18] sm:$0xff] %v176_v2 }
  0x1a   : > { %185 = vst [vmem:[#allocation2 + $0x10] sm:$0xff] %v177_v3 }
  0x1b   : > { %186 = vst [vmem:[#allocation2 + $0x8] sm:$0xff] %v178_v4 }
  0x1c   : > { %187 = vst [vmem:[#allocation2 + $0x20] sm:$0xff] %v179_v5 }
  0x1d   : > { %188 = vst [vmem:[#allocation2 + $0x28] sm:$0xff] %v180_v6 }
  0x1e   : > { %189 = vst [vmem:[#allocation2 + $0x38] sm:$0xff] %v181_v7 }
  0x1f   : > { %198 = vst [vmem:[#allocation3] sm:$0xff] %v174_v0 }
  0x20   : > { %199 = vst [vmem:[#allocation3 + $0x18] sm:$0xff] %v175_v1 }
  0x21   : > { %200 = vst [vmem:[#allocation3 + $0x10] sm:$0xff] %v176_v2 }
  0x22   : > { %201 = vst [vmem:[#allocation3 + $0x20] sm:$0xff] %v177_v3 }
  0x23   : > { %202 = vst [vmem:[#allocation3 + $0x28] sm:$0xff] %v178_v4 }
  0x24   : > { %203 = vst [vmem:[#allocation3 + $0x8] sm:$0xff] %v179_v5 }
  0x25   : > { %204 = vst [vmem:[#allocation3 + $0x30] sm:$0xff] %v180_v6 }
  0x26   : > { %205 = vst [vmem:[#allocation3 + $0x38] sm:$0xff] %v181_v7 }
  0x27 PF: > { %v1383_v8 = vld [vmem:[%s1902_s22 + $0x70] sm:$0xf]  ;;  %v1731_v9 = vld [vmem:[%s1902_s22 + $0x74] sm:$0xf0]  ;;  %v1375_v19 = vld [vmem:[%s1902_s22 + $0x60] sm:$0xf] }
  0x28   : > { %v1447_v10 = vld [vmem:[%s1902_s22 + $0xf0] sm:$0xf]  ;;  %v1384_v11 = vor.u32 %v1731_v9, %v1383_v8  ;;  %v1747_v12 = vld [vmem:[%s1902_s22 + $0xf4] sm:$0xf0]  ;;  %v1729_v21 = vld [vmem:[%s1902_s22 + $0x64] sm:$0xf0] }
  0x29   : > { %v1511_v13 = vld [vmem:[%s1902_s22 + $0x170] sm:$0xf]  ;;  %v1763_v14 = vld [vmem:[%s1902_s22 + $0x174] sm:$0xf0]  ;;  %v1448_v15 = vor.u32 %v1747_v12, %v1447_v10  ;;  %v1439_v22 = vld [vmem:[%s1902_s22 + $0xe0] sm:$0xf]  ;;  %v1376_v24 = vor.u32 %v1729_v21, %v1375_v19  ;;  %v214_v10 = vlaneseq }
  0x2a   : > { %v1512_v16 = vor.u32 %v1763_v14, %v1511_v13  ;;  %v1575_v17 = vld [vmem:[%s1902_s22 + $0x1f0] sm:$0xf]  ;;  %v1779_v18 = vld [vmem:[%s1902_s22 + $0x1f4] sm:$0xf0]  ;;  %929 = vmatpush.bf16.msra.mxu0 %v1384_v11  ;;  %v1745_v23 = vld [vmem:[%s1902_s22 + $0xe4] sm:$0xf0] }
  0x2b   : > { %v1576_v20 = vor.u32 %v1779_v18, %v1575_v17  ;;  %948 = vmatpush.bf16.msra.mxu1 %v1448_v15  ;;  %v1440_v25 = vor.u32 %v1745_v23, %v1439_v22  ;;  %v1503_v26 = vld [vmem:[%s1902_s22 + $0x160] sm:$0xf]  ;;  %v1761_v27 = vld [vmem:[%s1902_s22 + $0x164] sm:$0xf0]  ;;  %v1367_v31 = vld [vmem:[%s1902_s22 + $0x50] sm:$0xf] }
  0x2c   : > { %967 = vmatpush.bf16.msra.mxu2 %v1512_v16  ;;  %v1567_v28 = vld [vmem:[%s1902_s22 + $0x1e0] sm:$0xf]  ;;  %v1504_v29 = vor.u32 %v1761_v27, %v1503_v26  ;;  %v1777_v30 = vld [vmem:[%s1902_s22 + $0x1e4] sm:$0xf0]  ;;  %v1727_v32 = vld [vmem:[%s1902_s22 + $0x54] sm:$0xf0] }
  0x2d   : > { %986 = vmatpush.bf16.msra.mxu3 %v1576_v20  ;;  %v1568_v33 = vor.u32 %v1777_v30, %v1567_v28  ;;  %v1431_v34 = vld [vmem:[%s1902_s22 + $0xd0] sm:$0xf]  ;;  %v1743_v35 = vld [vmem:[%s1902_s22 + $0xd4] sm:$0xf0]  ;;  %v1368_v37 = vor.u32 %v1727_v32, %v1367_v31  ;;  %v1359_v43 = vld [vmem:[%s1902_s22 + $0x40] sm:$0xf] }
  0x2e   : > { %v1495_v36 = vld [vmem:[%s1902_s22 + $0x150] sm:$0xf]  ;;  %930 = vmatpush.bf16.msra.mxu0 %v1376_v24  ;;  %v1759_v38 = vld [vmem:[%s1902_s22 + $0x154] sm:$0xf0]  ;;  %v1432_v41 = vor.u32 %v1743_v35, %v1431_v34  ;;  %v1725_v44 = vld [vmem:[%s1902_s22 + $0x44] sm:$0xf0] }
  0x2f   : > { %v1559_v39 = vld [vmem:[%s1902_s22 + $0x1d0] sm:$0xf]  ;;  %v1775_v40 = vld [vmem:[%s1902_s22 + $0x1d4] sm:$0xf0]  ;;  %949 = vmatpush.bf16.msra.mxu1 %v1440_v25  ;;  %v1496_v42 = vor.u32 %v1759_v38, %v1495_v36  ;;  %v1423_v45 = vld [vmem:[%s1902_s22 + $0xc0] sm:$0xf]  ;;  %v1360_v52 = vor.u32 %v1725_v44, %v1359_v43 }
  0x30   : > { %968 = vmatpush.bf16.msra.mxu2 %v1504_v29  ;;  %v1560_v46 = vor.u32 %v1775_v40, %v1559_v39  ;;  %v1741_v47 = vld [vmem:[%s1902_s22 + $0xc4] sm:$0xf0]  ;;  %v1487_v48 = vld [vmem:[%s1902_s22 + $0x140] sm:$0xf]  ;;  %v1351_v55 = vld [vmem:[%s1902_s22 + $0x30] sm:$0xf] }
  0x31   : > { %987 = vmatpush.bf16.msra.mxu3 %v1568_v33  ;;  %v1757_v49 = vld [vmem:[%s1902_s22 + $0x144] sm:$0xf0]  ;;  %v1551_v50 = vld [vmem:[%s1902_s22 + $0x1c0] sm:$0xf]  ;;  %v1424_v53 = vor.u32 %v1741_v47, %v1423_v45  ;;  %v1723_v56 = vld [vmem:[%s1902_s22 + $0x34] sm:$0xf0] }
  0x32   : > { %v1773_v51 = vld [vmem:[%s1902_s22 + $0x1c4] sm:$0xf0]  ;;  %931 = vmatpush.bf16.msra.mxu0 %v1368_v37  ;;  %v1488_v54 = vor.u32 %v1757_v49, %v1487_v48  ;;  %v1415_v57 = vld [vmem:[%s1902_s22 + $0xb0] sm:$0xf]  ;;  %v1739_v59 = vld [vmem:[%s1902_s22 + $0xb4] sm:$0xf0]  ;;  %v1352_v0 = vor.u32 %v1723_v56, %v1351_v55 }
  0x33   : > { %950 = vmatpush.bf16.msra.mxu1 %v1432_v41  ;;  %v1552_v58 = vor.u32 %v1773_v51, %v1551_v50  ;;  %v1479_v60 = vld [vmem:[%s1902_s22 + $0x130] sm:$0xf]  ;;  %v1755_v61 = vld [vmem:[%s1902_s22 + $0x134] sm:$0xf0]  ;;  %v1416_v1 = vor.u32 %v1739_v59, %v1415_v57  ;;  %v1343_v3 = vld [vmem:[%s1902_s22 + $0x20] sm:$0xf] }
  0x34   : > { %969 = vmatpush.bf16.msra.mxu2 %v1496_v42  ;;  %v1543_v62 = vld [vmem:[%s1902_s22 + $0x1b0] sm:$0xf]  ;;  %v1771_v63 = vld [vmem:[%s1902_s22 + $0x1b4] sm:$0xf0]  ;;  %v1480_v2 = vor.u32 %v1755_v61, %v1479_v60  ;;  %v1721_v4 = vld [vmem:[%s1902_s22 + $0x24] sm:$0xf0] }
  0x35   : > { %988 = vmatpush.bf16.msra.mxu3 %v1560_v46  ;;  %v1407_v5 = vld [vmem:[%s1902_s22 + $0xa0] sm:$0xf]  ;;  %v1544_v6 = vor.u32 %v1771_v63, %v1543_v62  ;;  %v1737_v7 = vld [vmem:[%s1902_s22 + $0xa4] sm:$0xf0]  ;;  %v1335_v13 = vld [vmem:[%s1902_s22 + $0x10] sm:$0xf]  ;;  %v1344_v14 = vor.u32 %v1721_v4, %v1343_v3 }
  0x36   : > { %932 = vmatpush.bf16.msra.mxu0 %v1360_v52  ;;  %v1471_v8 = vld [vmem:[%s1902_s22 + $0x120] sm:$0xf]  ;;  %v1753_v9 = vld [vmem:[%s1902_s22 + $0x124] sm:$0xf0]  ;;  %v1719_v15 = vld [vmem:[%s1902_s22 + $0x14] sm:$0xf0]  ;;  %v1408_v18 = vor.u32 %v1737_v7, %v1407_v5 }
  0x37   : > { %951 = vmatpush.bf16.msra.mxu1 %v1424_v53  ;;  %v1535_v11 = vld [vmem:[%s1902_s22 + $0x1a0] sm:$0xf]  ;;  %v1769_v12 = vld [vmem:[%s1902_s22 + $0x1a4] sm:$0xf0]  ;;  %v1399_v16 = vld [vmem:[%s1902_s22 + $0x90] sm:$0xf]  ;;  %v1472_v19 = vor.u32 %v1753_v9, %v1471_v8  ;;  %v1336_v28 = vor.u32 %v1719_v15, %v1335_v13 }
  0x38   : > { %970 = vmatpush.bf16.msra.mxu2 %v1488_v54  ;;  %v1735_v17 = vld [vmem:[%s1902_s22 + $0x94] sm:$0xf0]  ;;  %v1463_v20 = vld [vmem:[%s1902_s22 + $0x110] sm:$0xf]  ;;  %v1536_v23 = vor.u32 %v1769_v12, %v1535_v11  ;;  %v1990_v27 = vshrl.u32 %v214_v10, 7  ;;  %v1994_v31 = vld [vmem:[#allocation2 + $0x28] sm:$0xff] }
  0x39   : > { %989 = vmatpush.bf16.msra.mxu3 %v1552_v58  ;;  %v1751_v21 = vld [vmem:[%s1902_s22 + $0x114] sm:$0xf0]  ;;  %v1527_v22 = vld [vmem:[%s1902_s22 + $0x190] sm:$0xf]  ;;  %v1327_v29 = vld [vmem:[%s1902_s22] sm:$0xf]  ;;  %v1400_v42 = vor.u32 %v1735_v17, %v1399_v16 }
  0x3a   : > { %933 = vmatpush.bf16.msra.mxu0 %v1352_v0  ;;  %v1767_v24 = vld [vmem:[%s1902_s22 + $0x194] sm:$0xf0]  ;;  %v1986_v25 = vld [vmem:[#allocation2 + $0x30] sm:$0xff]  ;;  %v1717_v30 = vld [vmem:[%s1902_s22 + $0x4] sm:$0xf0]  ;;  %v223_v38 = vand.u32 15, %v1990_v27  ;;  %v1464_v43 = vor.u32 %v1751_v21, %v1463_v20 }
  0x3b   : > { %952 = vmatpush.bf16.msra.mxu1 %v1416_v1  ;;  %v1988_v26 = vld [vmem:[#allocation2 + $0x18] sm:$0xff]  ;;  %v291_v32 = vrot.slane %v1986_v25, 7  ;;  %v1998_v34 = vld [vmem:[#allocation2] sm:$0xff]  ;;  %v2000_v35 = vld [vmem:[#allocation2 + $0x10] sm:$0xff]  ;;  %v297_v39 = vrot.slane %v1994_v31, 7  ;;  %vm299_vm0 = vcmp.lt.s32.totalorder %v1990_v27, 1  ;;  %v1528_v48 = vor.u32 %v1767_v24, %v1527_v22 }
  0x3c   : > { %971 = vmatpush.bf16.msra.mxu2 %v1480_v2  ;;  %v293_v33 = vrot.slane %v1988_v26, 7  ;;  %v1391_v36 = vld [vmem:[%s1902_s22 + $0x80] sm:$0xf]  ;;  %v1733_v37 = vld [vmem:[%s1902_s22 + $0x84] sm:$0xf0]  ;;  %v2007_v40 = vld [vmem:[#allocation2 + $0x38] sm:$0xff]  ;;  %v1328_v57 = vor.u32 %v1717_v30, %v1327_v29  ;;  %v2049_v13 = vpack.c.bf16 %v1988_v26, %v1986_v25  ;;  %v2056_v17 = vpack.c.bf16 %v2000_v35, %v1998_v34 }
  0x3d   : > { %990 = vmatpush.bf16.msra.mxu3 %v1544_v6  ;;  %v292_v41 = vrot.slane %v1998_v34, 7  ;;  %v1455_v44 = vld [vmem:[%s1902_s22 + $0x100] sm:$0xf]  ;;  %v1749_v45 = vld [vmem:[%s1902_s22 + $0x104] sm:$0xf0]  ;;  %v294_v46 = vrot.slane %v2000_v35, 7  ;;  %v306_v51 = vsel %vm299_vm0, %v297_v39, %v291_v32  ;;  %v1392_v63 = vor.u32 %v1733_v37, %v1391_v36 }
  0x3e   : > { %934 = vmatpush.bf16.msra.mxu0 %v1344_v14  ;;  %v298_v47 = vrot.slane %v2007_v40, 7  ;;  %v1519_v49 = vld [vmem:[%s1902_s22 + $0x180] sm:$0xf]  ;;  %v1765_v50 = vld [vmem:[%s1902_s22 + $0x184] sm:$0xf0]  ;;  %vm267_vm1 = vcmp.ne.s32.totalorder %v223_v38, 0  ;;  %v304_v58 = vsel %vm299_vm0, %v291_v32, %v293_v33  ;;  %v1456_v0 = vor.u32 %v1749_v45, %v1455_v44 }
  0x3f   : > { %953 = vmatpush.bf16.msra.mxu1 %v1408_v18  ;;  %v1861_v52 = vmov 0.0   ;;  %v1730_v55 = vld [vmem:[%s1902_s22 + $0x74] sm:$0xf]  ;;  %v1385_v56 = vld [vmem:[%s1902_s22 + $0x78] sm:$0xf0]  ;;  %v305_v1 = vsel %vm299_vm0, %v292_v41, %v294_v46  ;;  %v1520_v2 = vor.u32 %v1765_v50, %v1519_v49  ;;  %v217_v16 = vadd.s32 16, %v1990_v27 }
  0x40   : > { %972 = vmatpush.bf16.msra.mxu2 %v1472_v19  ;;  %v1321_v53 = vsel %vm267_vm1, 1.0, %v1861_v52  ;;  %v307_v54 = vsel %vm299_vm0, %v298_v47, %v292_v41  ;;  %v1703_v61 = vld [vmem:[%s1902_s22 + $0x2f0] sm:$0xf]  ;;  %v1811_v62 = vld [vmem:[%s1902_s22 + $0x2f4] sm:$0xf0]  ;;  %v1388_v3 = vor.u32 %v1730_v55, %v1385_v56  ;;  %v2058_v19 = vld [vmem:[#allocation2 + $0x8] sm:$0xff] }
  0x41   : > { %991 = vmatpush.bf16.msra.mxu3 %v1536_v23  ;;  %v308_v59 = vmul.f32 %v1321_v53, %v306_v51  ;;  %v309_v60 = vmul.f32 %v1321_v53, %v307_v54  ;;  %v1639_v4 = vld [vmem:[%s1902_s22 + $0x270] sm:$0xf]  ;;  %v1795_v5 = vld [vmem:[%s1902_s22 + $0x274] sm:$0xf0]  ;;  %v1746_v6 = vld [vmem:[%s1902_s22 + $0xf4] sm:$0xf]  ;;  %v1704_v8 = vor.u32 %v1811_v62, %v1703_v61 }
  0x42   : > { %935 = vmatpush.bf16.msra.mxu0 %v1336_v28  ;;  %v1449_v9 = vld [vmem:[%s1902_s22 + $0xf8] sm:$0xf0]  ;;  %v1728_v10 = vld [vmem:[%s1902_s22 + $0x64] sm:$0xf]  ;;  %v1377_v11 = vld [vmem:[%s1902_s22 + $0x68] sm:$0xf0]  ;;  %v1640_v18 = vor.u32 %v1795_v5, %v1639_v4 }
  0x43   : > { %954 = vmatpush.bf16.msra.mxu1 %v1400_v42  ;;  %v2040_v7 = vpack.c.bf16 %v304_v58, %v308_v59  ;;  %v2045_v12 = vpack.c.bf16 %v305_v1, %v309_v60  ;;  %v1695_v14 = vld [vmem:[%s1902_s22 + $0x2e0] sm:$0xf]  ;;  %v1809_v15 = vld [vmem:[%s1902_s22 + $0x2e4] sm:$0xf0]  ;;  %v1452_v21 = vor.u32 %v1746_v6, %v1449_v9  ;;  %v1380_v22 = vor.u32 %v1728_v10, %v1377_v11  ;;  %v1744_v28 = vld [vmem:[%s1902_s22 + $0xe4] sm:$0xf] }
  0x44   : > { %973 = vmatpush.bf16.msra.mxu2 %v1464_v43  ;;  %v2060_v20 = vld [vmem:[#allocation2 + $0x20] sm:$0xff]  ;;  %v1793_v24 = vld [vmem:[%s1902_s22 + $0x264] sm:$0xf0]  ;;  %v1696_v29 = vor.u32 %v1809_v15, %v1695_v14  ;;  %v1441_v30 = vld [vmem:[%s1902_s22 + $0xe8] sm:$0xf0]  ;;  %v237_v41 = vand.u32 15, %v217_v16 }
  0x45   : > { %992 = vmatpush.bf16.msra.mxu3 %v1528_v48  ;;  %v1631_v23 = vld [vmem:[%s1902_s22 + $0x260] sm:$0xf]  ;;  %v1726_v32 = vld [vmem:[%s1902_s22 + $0x54] sm:$0xf]  ;;  %v1369_v36 = vld [vmem:[%s1902_s22 + $0x58] sm:$0xf0]  ;;  %v1444_v48 = vor.u32 %v1744_v28, %v1441_v30 }
  0x46   : > { %936 = vmatpush.bf16.msra.mxu0 %v1328_v57  ;;  %v1687_v37 = vld [vmem:[%s1902_s22 + $0x2d0] sm:$0xf]  ;;  %v1807_v38 = vld [vmem:[%s1902_s22 + $0x2d4] sm:$0xf0]  ;;  %v295_v42 = vrot.slane %v2058_v19, 7  ;;  %v1632_v43 = vor.u32 %v1793_v24, %v1631_v23  ;;  %v296_v45 = vrot.slane %v2060_v20, 7  ;;  %v1372_v49 = vor.u32 %v1726_v32, %v1369_v36 }
  0x47   : > { %955 = vmatpush.bf16.msra.mxu1 %v1392_v63  ;;  %v1623_v44 = vld [vmem:[%s1902_s22 + $0x250] sm:$0xf]  ;;  %v1791_v50 = vld [vmem:[%s1902_s22 + $0x254] sm:$0xf0]  ;;  %v1742_v51 = vld [vmem:[%s1902_s22 + $0xd4] sm:$0xf]  ;;  %v1688_v53 = vor.u32 %v1807_v38, %v1687_v37  ;;  %v2122_v36 = vpack.c.bf16 %v1994_v31, %v2058_v19 }
  0x48   : > { %974 = vmatpush.bf16.msra.mxu2 %v1456_v0  ;;  %vm269_vm2 = vcmp.ne.s32.totalorder %v237_v41, 0  ;;  %v1433_v54 = vld [vmem:[%s1902_s22 + $0xd8] sm:$0xf0]  ;;  %v1724_v55 = vld [vmem:[%s1902_s22 + $0x44] sm:$0xf]  ;;  %v302_v60 = vsel %vm299_vm0, %v293_v33, %v295_v42  ;;  %v1624_v61 = vor.u32 %v1791_v50, %v1623_v44  ;;  %v303_v62 = vsel %vm299_vm0, %v294_v46, %v296_v45  ;;  %s1185_s14 = ssub.s32 0, %s1888_s13 }
  0x49   : > { %993 = vmatpush.bf16.msra.mxu3 %v1520_v2  ;;  %937 = vmatmul.bf16.vlgmr.msra.gmra.mxu0 %v2040_v7  ;;  %v1361_v56 = vld [vmem:[%s1902_s22 + $0x48] sm:$0xf0]  ;;  %v1679_v57 = vld [vmem:[%s1902_s22 + $0x2c0] sm:$0xf]  ;;  %v1805_v58 = vld [vmem:[%s1902_s22 + $0x2c4] sm:$0xf0]  ;;  %v1436_v63 = vor.u32 %v1742_v51, %v1433_v54  ;;  %v300_v46 = vsel %vm299_vm0, %v295_v42, %v297_v39  ;;  %v301_v15 = vsel %vm299_vm0, %v296_v45, %v298_v47  ;;  %s1709_s15 = smin.u32 %s1888_s13, %s1185_s14 }
  0x4a   : > { %956 = vmatmul.bf16.vlgmr.msra.gmra.mxu1 %v2045_v12  ;;  %1005 = vmatpush.bf16.msrb.mxu0 %v1640_v18  ;;  %v1322_v59 = vsel %vm269_vm2, 1.0, %v1861_v52  ;;  %v1364_v0 = vor.u32 %v1724_v55, %v1361_v56  ;;  %v1615_v1 = vld [vmem:[%s1902_s22 + $0x240] sm:$0xf]  ;;  %v1789_v2 = vld [vmem:[%s1902_s22 + $0x244] sm:$0xf0]  ;;  %v1680_v4 = vor.u32 %v1805_v58, %v1679_v57  ;;  %v216_v16 = vadd.s32 8, %v1990_v27 }
  0x4b   : > { %1024 = vmatpush.bf16.msrb.mxu1 %v1704_v8  ;;  %975 = vmatmul.bf16.vlgmr.msra.gmra.mxu2 %v2049_v13  ;;  %v1425_v33 = vld [vmem:[%s1902_s22 + $0xc8] sm:$0xf0]  ;;  %v312_v5 = vmul.f32 %v1322_v59, %v302_v60  ;;  %v1722_v6 = vld [vmem:[%s1902_s22 + $0x34] sm:$0xf]  ;;  %v1353_v8 = vld [vmem:[%s1902_s22 + $0x38] sm:$0xf0]  ;;  %v313_v9 = vmul.f32 %v1322_v59, %v303_v62  ;;  %v1616_v14 = vor.u32 %v1789_v2, %v1615_v1 }
  0x4c   : > { %1043 = vmatpush.bf16.msrb.mxu2 %v1388_v3  ;;  %994 = vmatmul.bf16.vlgmr.msra.gmra.mxu3 %v2056_v17  ;;  %v1740_v3 = vld [vmem:[%s1902_s22 + $0xc4] sm:$0xf]  ;;  %v1671_v10 = vld [vmem:[%s1902_s22 + $0x2b0] sm:$0xf]  ;;  %v1803_v11 = vld [vmem:[%s1902_s22 + $0x2b4] sm:$0xf0]  ;;  %v1356_v18 = vor.u32 %v1722_v6, %v1353_v8  ;;  %v2128_v41 = vpack.c.bf16 %v2007_v40, %v2060_v20 }
  0x4d   : > { %1062 = vmatpush.bf16.msrb.mxu3 %v1452_v21  ;;  %v1428_v39 = vor.u32 %v1740_v3, %v1425_v33  ;;  %v1607_v21 = vld [vmem:[%s1902_s22 + $0x230] sm:$0xf]  ;;  %v1738_v23 = vld [vmem:[%s1902_s22 + $0xb4] sm:$0xf]  ;;  %v2113_v24 = vpack.c.bf16 %v300_v46, %v312_v5  ;;  %v1672_v28 = vor.u32 %v1803_v11, %v1671_v10  ;;  %v1720_v47 = vld [vmem:[%s1902_s22 + $0x24] sm:$0xf]  ;;  %v2118_v32 = vpack.c.bf16 %v301_v15, %v313_v9 }
  0x4e   : > { %1006 = vmatpush.bf16.msrb.mxu0 %v1632_v43  ;;  %v1345_v30 = vld [vmem:[%s1902_s22 + $0x28] sm:$0xf0]  ;;  %v1663_v37 = vld [vmem:[%s1902_s22 + $0x2a0] sm:$0xf]  ;;  %v1801_v38 = vld [vmem:[%s1902_s22 + $0x2a4] sm:$0xf0] }
  0x4f   : > { %1025 = vmatpush.bf16.msrb.mxu1 %v1696_v29  ;;  %v1417_v29 = vld [vmem:[%s1902_s22 + $0xb8] sm:$0xf0]  ;;  %v1599_v43 = vld [vmem:[%s1902_s22 + $0x220] sm:$0xf]  ;;  %v1785_v44 = vld [vmem:[%s1902_s22 + $0x224] sm:$0xf0] }
  0x50   : > { %1044 = vmatpush.bf16.msrb.mxu2 %v1380_v22  ;;  %v1787_v22 = vld [vmem:[%s1902_s22 + $0x234] sm:$0xf0]  ;;  %v1420_v45 = vor.u32 %v1738_v23, %v1417_v29  ;;  %v1409_v50 = vld [vmem:[%s1902_s22 + $0xa8] sm:$0xf0]  ;;  %v230_v51 = vand.u32 15, %v216_v16  ;;  %v1600_v57 = vor.u32 %v1785_v44, %v1599_v43  ;;  %v318_v62 = vrot.slane %v1988_v26, 1 }
  0x51   : > { %1063 = vmatpush.bf16.msrb.mxu3 %v1444_v48  ;;  %v1608_v42 = vor.u32 %v1787_v22, %v1607_v21  ;;  %v1348_v48 = vor.u32 %v1720_v47, %v1345_v30  ;;  %v1718_v54 = vld [vmem:[%s1902_s22 + $0x14] sm:$0xf]  ;;  %v1337_v55 = vld [vmem:[%s1902_s22 + $0x18] sm:$0xf0]  ;;  %v1591_v56 = vld [vmem:[%s1902_s22 + $0x210] sm:$0xf] }
  0x52   : > { %1007 = vmatpush.bf16.msrb.mxu0 %v1624_v61  ;;  %v1783_v58 = vld [vmem:[%s1902_s22 + $0x214] sm:$0xf0]  ;;  %v1655_v59 = vld [vmem:[%s1902_s22 + $0x290] sm:$0xf]  ;;  %v1734_v61 = vld [vmem:[%s1902_s22 + $0x94] sm:$0xf]  ;;  %v1340_v3 = vor.u32 %v1718_v54, %v1337_v55 }
  0x53   : > { %1026 = vmatpush.bf16.msrb.mxu1 %v1688_v53  ;;  %v1664_v53 = vor.u32 %v1801_v38, %v1663_v37  ;;  %v1799_v60 = vld [vmem:[%s1902_s22 + $0x294] sm:$0xf0]  ;;  %v321_v1 = vrot.slane %v2060_v20, 1  ;;  %v1716_v33 = vld [vmem:[%s1902_s22 + $0x4] sm:$0xf]  ;;  %vm280_vm3 = vcmp.ne.s32.totalorder %v230_v51, 15  ;;  %v1592_v8 = vor.u32 %v1783_v58, %v1591_v56 }
  0x54   : > { %1045 = vmatpush.bf16.msrb.mxu2 %v1372_v49  ;;  %v1736_v49 = vld [vmem:[%s1902_s22 + $0xa4] sm:$0xf]  ;;  %vm324_vm4 = vcmp.lt.s32.totalorder %v1990_v27, 7  ;;  %v1656_v26 = vor.u32 %v1799_v60, %v1655_v59  ;;  %v1329_v5 = vld [vmem:[%s1902_s22 + $0x8] sm:$0xf0]  ;;  %v316_v9 = vrot.slane %v1986_v25, 1 }
  0x55   : > { %1064 = vmatpush.bf16.msrb.mxu3 %v1436_v63  ;;  %v320_v63 = vrot.slane %v2058_v19, 1  ;;  %v1412_v2 = vor.u32 %v1736_v49, %v1409_v50  ;;  %v1797_v6 = vld [vmem:[%s1902_s22 + $0x284] sm:$0xf0]  ;;  %v1583_v46 = vld [vmem:[%s1902_s22 + $0x200] sm:$0xf]  ;;  %v317_v16 = vrot.slane %v1998_v34, 1  ;;  %v1332_v23 = vor.u32 %v1716_v33, %v1329_v5 }
  0x56   : > { %1008 = vmatpush.bf16.msrb.mxu0 %v1616_v14  ;;  %v1794_v10 = vld [vmem:[%s1902_s22 + $0x274] sm:$0xf]  ;;  %v1641_v11 = vld [vmem:[%s1902_s22 + $0x278] sm:$0xf0]  ;;  %v1323_v14 = vsel %vm280_vm3, 1.0, %v1861_v52  ;;  %v329_v54 = vsel %vm324_vm4, %v316_v9, %v318_v62  ;;  %v218_v60 = vadd.s32 24, %v1990_v27 }
  0x57   : > { %1027 = vmatpush.bf16.msrb.mxu1 %v1680_v4  ;;  %v1401_v4 = vld [vmem:[%s1902_s22 + $0x98] sm:$0xf0]  ;;  %v327_v15 = vsel %vm324_vm4, %v318_v62, %v320_v63  ;;  %v1732_v29 = vld [vmem:[%s1902_s22 + $0x84] sm:$0xf]  ;;  %v1393_v47 = vld [vmem:[%s1902_s22 + $0x88] sm:$0xf0]  ;;  %v1644_v37 = vor.u32 %v1794_v10, %v1641_v11 }
  0x58   : > { %1046 = vmatpush.bf16.msrb.mxu2 %v1364_v0  ;;  %v319_v0 = vrot.slane %v2000_v35, 1  ;;  %v1647_v35 = vld [vmem:[%s1902_s22 + $0x280] sm:$0xf]  ;;  %v1577_v21 = vld [vmem:[%s1902_s22 + $0x1f8] sm:$0xf0]  ;;  %v1404_v22 = vor.u32 %v1734_v61, %v1401_v4  ;;  %v335_v44 = vmul.f32 %v1323_v14, %v327_v15  ;;  %v1396_v56 = vor.u32 %v1732_v29, %v1393_v47  ;;  %p1184_p8 = scmp.lt.s32.totalorder %s1888_s13, 0 }
  0x59   : > { %1065 = vmatpush.bf16.msrb.mxu3 %v1428_v39  ;;  %942 = vmatmul.bf16.gmra.mxu0 %v2113_v24  ;;  %v1648_v30 = vor.u32 %v1797_v6, %v1647_v35  ;;  %v1762_v38 = vld [vmem:[%s1902_s22 + $0x174] sm:$0xf]  ;;  %v1705_v49 = vld [vmem:[%s1902_s22 + $0x2f8] sm:$0xf0]  ;;  %v1792_v50 = vld [vmem:[%s1902_s22 + $0x264] sm:$0xf] }
  0x5a   : > { %961 = vmatmul.bf16.gmra.mxu1 %v2118_v32  ;;  %1009 = vmatpush.bf16.msrb.mxu0 %v1608_v42  ;;  %v328_v39 = vsel %vm324_vm4, %v319_v0, %v321_v1  ;;  %v1513_v42 = vld [vmem:[%s1902_s22 + $0x178] sm:$0xf0]  ;;  %v1810_v43 = vld [vmem:[%s1902_s22 + $0x2f4] sm:$0xf]  ;;  %v1633_v51 = vld [vmem:[%s1902_s22 + $0x268] sm:$0xf0]  ;;  %v330_v55 = vsel %vm324_vm4, %v317_v16, %v319_v0  ;;  %v2194_v4 = vpack.c.bf16 %v335_v44, %v329_v54 }
  0x5b   : > { %1028 = vmatpush.bf16.msrb.mxu1 %v1672_v28  ;;  %980 = vmatmul.bf16.gmra.mxu2 %v2122_v36  ;;  %v1781_v28 = vld [vmem:[%s1902_s22 + $0x204] sm:$0xf0]  ;;  %v1760_v58 = vld [vmem:[%s1902_s22 + $0x164] sm:$0xf]  ;;  %v1505_v59 = vld [vmem:[%s1902_s22 + $0x168] sm:$0xf0]  ;;  %v1708_v61 = vor.u32 %v1810_v43, %v1705_v49  ;;  %v1636_v62 = vor.u32 %v1792_v50, %v1633_v51 }
  0x5c   : > { %1047 = vmatpush.bf16.msrb.mxu2 %v1356_v18  ;;  %999 = vmatmul.bf16.gmra.mxu3 %v2128_v41  ;;  %v1778_v18 = vld [vmem:[%s1902_s22 + $0x1f4] sm:$0xf]  ;;  %v1808_v0 = vld [vmem:[%s1902_s22 + $0x2e4] sm:$0xf]  ;;  %v1625_v35 = vld [vmem:[%s1902_s22 + $0x258] sm:$0xf0]  ;;  %v1508_v6 = vor.u32 %v1760_v58, %v1505_v59 }
  0x5d   : > { %1066 = vmatpush.bf16.msrb.mxu3 %v1420_v45  ;;  %v336_v45 = vmul.f32 %v1323_v14, %v328_v39  ;;  %v1790_v5 = vld [vmem:[%s1902_s22 + $0x254] sm:$0xf]  ;;  %v1497_v10 = vld [vmem:[%s1902_s22 + $0x158] sm:$0xf0]  ;;  %v244_v11 = vand.u32 15, %v218_v60  ;;  %v322_v29 = vrot.slane %v1994_v31, 1 }
  0x5e   : > { %1010 = vmatpush.bf16.msrb.mxu0 %v1600_v57  ;;  %v1516_v57 = vor.u32 %v1762_v38, %v1513_v42  ;;  %v1628_v15 = vor.u32 %v1790_v5, %v1625_v35  ;;  %v1774_v39 = vld [vmem:[%s1902_s22 + $0x1d4] sm:$0xf]  ;;  %v323_v47 = vrot.slane %v2007_v40, 1  ;;  %v1756_v38 = vld [vmem:[%s1902_s22 + $0x144] sm:$0xf]  ;;  %s1187_s16 = sand.u32 1, %s1709_s15  }
  0x5f   : > { %1029 = vmatpush.bf16.msrb.mxu1 %v1664_v53  ;;  %v1584_v53 = vor.u32 %v1781_v28, %v1583_v46  ;;  %v2196_v33 = vpack.c.bf16 %v336_v45, %v330_v55  ;;  %v1758_v46 = vld [vmem:[%s1902_s22 + $0x154] sm:$0xf]  ;;  %v1617_v28 = vld [vmem:[%s1902_s22 + $0x248] sm:$0xf0]  ;;  %vm282_vm5 = vcmp.ne.s32.totalorder %v244_v11, 15  ;;  %v331_v50 = vsel %vm324_vm4, %v322_v29, %v316_v9  ;;  %s1188_s17 = ssub.s32 0, %s1187_s16 }
  0x60   : > { %1048 = vmatpush.bf16.msrb.mxu2 %v1348_v48  ;;  %v1580_v48 = vor.u32 %v1778_v18, %v1577_v21  ;;  %v1561_v18 = vld [vmem:[%s1902_s22 + $0x1d8] sm:$0xf0]  ;;  %v1806_v21 = vld [vmem:[%s1902_s22 + $0x2d4] sm:$0xf]  ;;  %v1489_v42 = vld [vmem:[%s1902_s22 + $0x148] sm:$0xf0]  ;;  %v332_v51 = vsel %vm324_vm4, %v323_v47, %v317_v16  ;;  %s2431_s17 = smov (!%p1184_p8, %s1188_s17), %s1187_s16 }
  0x61   : > { %1067 = vmatpush.bf16.msrb.mxu3 %v1412_v2  ;;  %v1776_v2 = vld [vmem:[%s1902_s22 + $0x1e4] sm:$0xf]  ;;  %v1553_v31 = vld [vmem:[%s1902_s22 + $0x1c8] sm:$0xf0]  ;;  %v1786_v40 = vld [vmem:[%s1902_s22 + $0x234] sm:$0xf] }
  0x62   : > { %1011 = vmatpush.bf16.msrb.mxu0 %v1592_v8  ;;  %v1772_v43 = vld [vmem:[%s1902_s22 + $0x1c4] sm:$0xf]  ;;  %v1681_v45 = vld [vmem:[%s1902_s22 + $0x2c8] sm:$0xf0]  ;;  %v1324_v49 = vsel %vm282_vm5, 1.0, %v1861_v52  ;;  %p1711_p9 = scmp.lt.s32.totalorder %s2431_s17, 0 }
  0x63   : > { %1030 = vmatpush.bf16.msrb.mxu1 %v1656_v26  ;;  %v1697_v26 = vld [vmem:[%s1902_s22 + $0x2e8] sm:$0xf0]  ;;  %v1804_v44 = vld [vmem:[%s1902_s22 + $0x2c4] sm:$0xf]  ;;  %v1556_v54 = vor.u32 %v1772_v43, %v1553_v31  ;;  %v1754_v55 = vld [vmem:[%s1902_s22 + $0x134] sm:$0xf]  ;;  %v339_v58 = vmul.f32 %v1324_v49, %v331_v50  ;;  %v340_v16 = vmul.f32 %v1324_v49, %v332_v51 }
  0x64   : > { %1049 = vmatpush.bf16.msrb.mxu2 %v1340_v3  ;;  %v1569_v3 = vld [vmem:[%s1902_s22 + $0x1e8] sm:$0xf0]  ;;  %v1700_v14 = vor.u32 %v1808_v0, %v1697_v26  ;;  %v1684_v25 = vor.u32 %v1804_v44, %v1681_v45  ;;  %v1770_v9 = vld [vmem:[%s1902_s22 + $0x1b4] sm:$0xf]  ;;  %v1545_v34 = vld [vmem:[%s1902_s22 + $0x1b8] sm:$0xf0] }
  0x65   : > { %1068 = vmatpush.bf16.msrb.mxu3 %v1404_v22  ;;  %v1572_v8 = vor.u32 %v1776_v2, %v1569_v3  ;;  %v1689_v22 = vld [vmem:[%s1902_s22 + $0x2d8] sm:$0xf0]  ;;  %v1784_v60 = vld [vmem:[%s1902_s22 + $0x224] sm:$0xf]  ;;  %v326_v2 = vsel %vm324_vm4, %v321_v1, %v323_v47  ;;  %v1548_v0 = vor.u32 %v1770_v9, %v1545_v34  ;;  %v1473_v5 = vld [vmem:[%s1902_s22 + $0x128] sm:$0xf0] }
  0x66   : > { %1012 = vmatpush.bf16.msrb.mxu0 %v1584_v53  ;;  %v1492_v53 = vor.u32 %v1756_v38, %v1489_v42  ;;  %v1673_v59 = vld [vmem:[%s1902_s22 + $0x2b8] sm:$0xf0]  ;;  %v1752_v26 = vld [vmem:[%s1902_s22 + $0x124] sm:$0xf]  ;;  %v1537_v20 = vld [vmem:[%s1902_s22 + $0x1a8] sm:$0xf0]  ;;  %v352_v1 = vpack.c.bf16 %v340_v16, %v326_v2 }
  0x67   : > { %1031 = vmatpush.bf16.msrb.mxu1 %v1648_v30  ;;  %v1500_v30 = vor.u32 %v1758_v46, %v1497_v10  ;;  %v1768_v35 = vld [vmem:[%s1902_s22 + $0x1a4] sm:$0xf]  ;;  %v1782_v46 = vld [vmem:[%s1902_s22 + $0x214] sm:$0xf]  ;;  %v1593_v10 = vld [vmem:[%s1902_s22 + $0x218] sm:$0xf0]  ;;  %v1476_v11 = vor.u32 %v1752_v26, %v1473_v5 }
  0x68   : > { %1050 = vmatpush.bf16.msrb.mxu2 %v1332_v23  ;;  %v1788_v23 = vld [vmem:[%s1902_s22 + $0x244] sm:$0xf]  ;;  %v1457_v43 = vld [vmem:[%s1902_s22 + $0x108] sm:$0xf0]  ;;  %s1194_s18 = sadd.s32 2, %s2431_s17  ;;  %p1197_p10 = scmp.ne.s32.totalorder %s1888_s13, 8 }
  0x69   : > { %1069 = vmatpush.bf16.msrb.mxu3 %v1396_v56  ;;  %1013 = vmatmul.bf16.vlgmr.msrb.gmra.mxu0 %v2194_v4  ;;  %v1481_v56 = vld [vmem:[%s1902_s22 + $0x138] sm:$0xf0]  ;;  %v1780_v47 = vld [vmem:[%s1902_s22 + $0x204] sm:$0xf]  ;;  %v1521_v44 = vld [vmem:[%s1902_s22 + $0x188] sm:$0xf0]  ;;  %s2433_s18 = smov (!%p1711_p9, %s1194_s18), %s2431_s17 }
  0x6a   : > { %1081 = vmatpush.bf16.msra.mxu0 %v1516_v57  ;;  %1032 = vmatmul.bf16.vlgmr.msrb.gmra.mxu1 %v2196_v33  ;;  %v1802_v57 = vld [vmem:[%s1902_s22 + $0x2b4] sm:$0xf]  ;;  %v1484_v3 = vor.u32 %v1754_v55, %v1481_v56  ;;  %v1748_v42 = vld [vmem:[%s1902_s22 + $0x104] sm:$0xf]  ;;  %p1198_p11 = scmp.ne.s32.totalorder %s2433_s18, 1  ;;  %s1157_s20 = sld [smem:[#allocation4 + %s1888_s13]] }
  0x6b   : > { %1100 = vmatpush.bf16.msra.mxu1 %v1580_v48  ;;  %1051 = vmatmul.bf16.vlgmr.msrb.gmra.mxu2 %v2040_v7  ;;  %v1692_v7 = vor.u32 %v1806_v21, %v1689_v22  ;;  %v1609_v48 = vld [vmem:[%s1902_s22 + $0x238] sm:$0xf0]  ;;  %v1676_v19 = vor.u32 %v1802_v57, %v1673_v59  ;;  %v1596_v21 = vor.u32 %v1782_v46, %v1593_v10  ;;  %v1766_v22 = vld [vmem:[%s1902_s22 + $0x194] sm:$0xf]  ;;  %v1764_v31 = vld [vmem:[%s1902_s22 + $0x184] sm:$0xf] }
  0x6c   : > { %1119 = vmatpush.bf16.msra.mxu2 %v1644_v37  ;;  %1070 = vmatmul.bf16.vlgmr.msrb.gmra.mxu3 %v2045_v12  ;;  %v1564_v37 = vor.u32 %v1774_v39, %v1561_v18  ;;  %v1620_v12 = vor.u32 %v1788_v23, %v1617_v28  ;;  %v1612_v52 = vor.u32 %v1786_v40, %v1609_v48  ;;  %v1465_v39 = vld [vmem:[%s1902_s22 + $0x118] sm:$0xf0]  ;;  %v1798_v28 = vld [vmem:[%s1902_s22 + $0x294] sm:$0xf]  ;;  %v1796_v45 = vld [vmem:[%s1902_s22 + $0x284] sm:$0xf]  ;;  %p2289_p12 = pnand %p1198_p11, %p1197_p10 }
  0x6d   : > { %1138 = vmatpush.bf16.msra.mxu3 %v1708_v61  ;;  %v1601_v61 = vld [vmem:[%s1902_s22 + $0x228] sm:$0xf0]  ;;  %v1529_v23 = vld [vmem:[%s1902_s22 + $0x198] sm:$0xf0]  ;;  %v1460_v48 = vor.u32 %v1748_v42, %v1457_v43 }
  0x6e   : > { %1082 = vmatpush.bf16.msra.mxu0 %v1508_v6  ;;  %v1800_v6 = vld [vmem:[%s1902_s22 + $0x2a4] sm:$0xf]  ;;  %v1532_v38 = vor.u32 %v1766_v22, %v1529_v23  ;;  %v1649_v40 = vld [vmem:[%s1902_s22 + $0x288] sm:$0xf0] }
  0x6f   : > { %1101 = vmatpush.bf16.msra.mxu1 %v1572_v8  ;;  %v1665_v8 = vld [vmem:[%s1902_s22 + $0x2a8] sm:$0xf0] }
  0x70   : > { %1120 = vmatpush.bf16.msra.mxu2 %v1636_v62  ;;  %v325_v62 = vsel %vm324_vm4, %v320_v63, %v322_v29  ;;  %v1604_v63 = vor.u32 %v1784_v60, %v1601_v61  ;;  %v1668_v18 = vor.u32 %v1800_v6, %v1665_v8  ;;  %v1657_v29 = vld [vmem:[%s1902_s22 + $0x298] sm:$0xf0]  ;;  %v2294_v5 = vstv %s1157_s20 }
  0x71   : > { %1139 = vmatpush.bf16.msra.mxu3 %v1700_v14  ;;  %v351_v27 = vpack.c.bf16 %v339_v58, %v325_v62  ;;  %v1540_v14 = vor.u32 %v1768_v35, %v1537_v20 }
  0x72   : > { %1083 = vmatpush.bf16.msra.mxu0 %v1500_v30  ;;  %v1585_v30 = vld [vmem:[%s1902_s22 + $0x208] sm:$0xf0] }
  0x73   : > { %1102 = vmatpush.bf16.msra.mxu1 %v1564_v37 }
  0x74   : > { %1121 = vmatpush.bf16.msra.mxu2 %v1628_v15  ;;  %v1750_v15 = vld [vmem:[%s1902_s22 + $0x114] sm:$0xf] }
  0x75   : > { %1140 = vmatpush.bf16.msra.mxu3 %v1692_v7  ;;  %v1468_v37 = vor.u32 %v1750_v15, %v1465_v39  ;;  %v1660_v7 = vor.u32 %v1798_v28, %v1657_v29 }
  0x76   : > { %1084 = vmatpush.bf16.msra.mxu0 %v1492_v53 }
  0x77   : > { %1103 = vmatpush.bf16.msra.mxu1 %v1556_v54 }
  0x78   : > { %1122 = vmatpush.bf16.msra.mxu2 %v1620_v12  ;;  %v1588_v12 = vor.u32 %v1780_v47, %v1585_v30 }
  0x79   : > { %1141 = vmatpush.bf16.msra.mxu3 %v1684_v25  ;;  %1018 = vmatmul.bf16.gmra.mxu0 %v351_v27 }
  0x7a   : > { %1085 = vmatpush.bf16.msra.mxu0 %v1484_v3  ;;  %1037 = vmatmul.bf16.gmra.mxu1 %v352_v1 }
  0x7b   : > { %1104 = vmatpush.bf16.msra.mxu1 %v1548_v0  ;;  %1056 = vmatmul.bf16.gmra.mxu2 %v2113_v24  ;;  %v1524_v24 = vor.u32 %v1764_v31, %v1521_v44 }
  0x7c   : > { %1123 = vmatpush.bf16.msra.mxu2 %v1612_v52  ;;  %1075 = vmatmul.bf16.gmra.mxu3 %v2118_v32  ;;  %v1652_v32 = vor.u32 %v1796_v45, %v1649_v40 }
  0x7d   : > { %1142 = vmatpush.bf16.msra.mxu3 %v1676_v19 }
  0x7e   : > { %1086 = vmatpush.bf16.msra.mxu0 %v1476_v11 }
  0x7f   : > { %1105 = vmatpush.bf16.msra.mxu1 %v1540_v14 }
  0x80   : > { %1124 = vmatpush.bf16.msra.mxu2 %v1604_v63 }
  0x81   : > { %1143 = vmatpush.bf16.msra.mxu3 %v1668_v18 }
  0x82   : > { %1087 = vmatpush.bf16.msra.mxu0 %v1468_v37 }
  0x83   : > { %1106 = vmatpush.bf16.msra.mxu1 %v1532_v38 }
  0x84   : > { %1125 = vmatpush.bf16.msra.mxu2 %v1596_v21 }
  0x85   : > { %1144 = vmatpush.bf16.msra.mxu3 %v1660_v7 }
  0x86   : > { %1088 = vmatpush.bf16.msra.mxu0 %v1460_v48 }
  0x87   : > { %1107 = vmatpush.bf16.msra.mxu1 %v1524_v24 }
  0x88   : > { %1126 = vmatpush.bf16.msra.mxu2 %v1588_v12 }
  0x89   : > { %1145 = vmatpush.bf16.msra.mxu3 %v1652_v32  ;;  %1089 = vmatmul.bf16.vlgmr.msra.gmra.mxu0 %v2049_v13 }
  0x8a   : > { %1108 = vmatmul.bf16.vlgmr.msra.gmra.mxu1 %v2056_v17 }
  0x8b   : > { %1127 = vmatmul.bf16.vlgmr.msra.gmra.mxu2 %v2194_v4 }
  0x8c   : > { %1146 = vmatmul.bf16.vlgmr.msra.gmra.mxu3 %v2196_v33 }
  0x99   : > { %1094 = vmatmul.bf16.gmra.mxu0 %v2122_v36 }
  0x9a   : > { %1113 = vmatmul.bf16.gmra.mxu1 %v2128_v41 }
  0x9b   : > { %1132 = vmatmul.bf16.gmra.mxu2 %v351_v27 }
  0x9c   : > { %1151 = vmatmul.bf16.gmra.mxu3 %v352_v1 }
  0xc6   : > { %v938_v13 = vpop.f32.mrf.mxu0 }
  0xc7   : > { %v957_v17 = vpop.f32.mrf.mxu1 }
  0xc8   : > { %v958_v36 = vadd.f32 %v957_v17, %v938_v13 }
  0xce   : > { %v976_v41 = vpop.f32.mrf.mxu2  ;;  %v940_v49 = vpop.f32.mrf.mxu0 }
  0xcf   : > { %v977_v4 = vadd.f32 %v976_v41, %v958_v36  ;;  %v995_v33 = vpop.f32.mrf.mxu3  ;;  %v959_v50 = vpop.f32.mrf.mxu1 }
  0xd0   : > { %v960_v53 = vadd.f32 %v959_v50, %v940_v49 }
  0xd1   : > { %v996_v51 = vadd.f32 %v995_v33, %v977_v4 }
  0xd6   : > { %v978_v54 = vpop.f32.mrf.mxu2  ;;  %v943_v25 = vpop.f32.mrf.mxu0 }
  0xd7   : > { %v979_v55 = vadd.f32 %v978_v54, %v960_v53  ;;  %v997_v56 = vpop.f32.mrf.mxu3  ;;  %v962_v52 = vpop.f32.mrf.mxu1 }
  0xd8   : > { %v963_v34 = vadd.f32 %v962_v52, %v943_v25 }
  0xd9   : > { %v998_v9 = vadd.f32 %v997_v56, %v979_v55 }
  0xde   : > { %v981_v57 = vpop.f32.mrf.mxu2  ;;  %v945_v59 = vpop.f32.mrf.mxu0 }
  0xdf   : > { %v982_v58 = vadd.f32 %v981_v57, %v963_v34  ;;  %v1000_v16 = vpop.f32.mrf.mxu3  ;;  %v964_v60 = vpop.f32.mrf.mxu1 }
  0xe0   : > { %v965_v21 = vadd.f32 %v964_v60, %v945_v59 }
  0xe1   : > { %v1001_v61 = vadd.f32 %v1000_v16, %v982_v58 }
  0xe6   : > { %v983_v62 = vpop.f32.mrf.mxu2  ;;  %v1014_v3 = vpop.f32.mrf.mxu0 }
  0xe7   : > { %v1002_v2 = vpop.f32.mrf.mxu3  ;;  %v1033_v0 = vpop.f32.mrf.mxu1  ;;  %v1015_v26 = vadd.f32 %v1014_v3, %v996_v51  ;;  %v984_v23 = vadd.f32 %v983_v62, %v965_v21 }
  0xe9   : > { %v2296_v19 = vadd.f32 %v1033_v0, %v1015_v26  ;;  %v1003_v47 = vadd.f32 %v1002_v2, %v984_v23 }
  0xeb   : > { %vm1158_vm6 = vcmp.ge.f32.partialorder %v2296_v19, 0.0  ;;  %v1167_v63 = vmul.f32 %v2294_v5, %v2296_v19 }
  0xed   : > { %v2302_v35 = vsel %vm1158_vm6, %v2296_v19, %v1167_v63 }
  0xee   : > { %v1052_v20 = vpop.f32.mrf.mxu2  ;;  %v1016_v27 = vpop.f32.mrf.mxu0 }
  0xef   : > { %v1071_v6 = vpop.f32.mrf.mxu3  ;;  %v1035_v1 = vpop.f32.mrf.mxu1  ;;  %v1017_v8 = vadd.f32 %v1016_v27, %v998_v9 }
  0xf0   : > { %v1072_v48 = vadd.f32 %v1071_v6, %v1052_v20 }
  0xf1   : > { %v2304_v46 = vadd.f32 %v1035_v1, %v1017_v8 }
  0xf3   : > { %vm1160_vm7 = vcmp.ge.f32.partialorder %v2304_v46, 0.0  ;;  %v1169_v10 = vmul.f32 %v2294_v5, %v2304_v46 }
  0xf5   : > { %v2310_v11 = vsel %vm1160_vm7, %v2304_v46, %v1169_v10 }
  0xf6   : > { %v1054_v14 = vpop.f32.mrf.mxu2  ;;  %v1019_v39 = vpop.f32.mrf.mxu0 }
  0xf7   : > { %v1073_v15 = vpop.f32.mrf.mxu3  ;;  %v1038_v18 = vpop.f32.mrf.mxu1  ;;  %v1020_v22 = vadd.f32 %v1019_v39, %v1001_v61 }
  0xf8   : > { %v1074_v4 = vadd.f32 %v1073_v15, %v1054_v14 }
  0xf9   : > { %v2312_v28 = vadd.f32 %v1038_v18, %v1020_v22 }
  0xfb   : > { %vm1162_vm8 = vcmp.ge.f32.partialorder %v2312_v28, 0.0  ;;  %v1171_v29 = vmul.f32 %v2294_v5, %v2312_v28 }
  0xfd   : > { %v2318_v30 = vsel %vm1162_vm8, %v2312_v28, %v1171_v29 }
  0xfe   : > { %v1057_v37 = vpop.f32.mrf.mxu2  ;;  %v1021_v42 = vpop.f32.mrf.mxu0 }
  0xff   : > { %v1076_v38 = vpop.f32.mrf.mxu3  ;;  %v1040_v7 = vpop.f32.mrf.mxu1  ;;  %v1022_v12 = vadd.f32 %v1021_v42, %v1003_v47 }
 0x100   : > { %v1077_v9 = vadd.f32 %v1076_v38, %v1057_v37 }
 0x101   : > { %v2320_v43 = vadd.f32 %v1040_v7, %v1022_v12 }
 0x103   : > { %vm1164_vm9 = vcmp.ge.f32.partialorder %v2320_v43, 0.0  ;;  %v1173_v31 = vmul.f32 %v2294_v5, %v2320_v43 }
 0x105   : > { %v2326_v44 = vsel %vm1164_vm9, %v2320_v43, %v1173_v31 }
 0x106   : > { %v1059_v45 = vpop.f32.mrf.mxu2  ;;  %v1090_v24 = vpop.f32.mrf.mxu0 }
 0x107   : > { %v1078_v40 = vpop.f32.mrf.mxu3  ;;  %v1109_v32 = vpop.f32.mrf.mxu1  ;;  %v1091_v13 = vadd.f32 %v1090_v24, %v1072_v48 }
 0x108   : > { %v1079_v0 = vadd.f32 %v1078_v40, %v1059_v45 }
 0x109   : > { %v1110_v17 = vadd.f32 %v1109_v32, %v1091_v13 }
 0x10e   : > { %v1128_v36 = vpop.f32.mrf.mxu2  ;;  %v1092_v49 = vpop.f32.mrf.mxu0 }
 0x10f   : > { %v1147_v41 = vpop.f32.mrf.mxu3  ;;  %v1129_v33 = vadd.f32 %v1128_v36, %v1110_v17  ;;  %v1111_v50 = vpop.f32.mrf.mxu1  ;;  %v1093_v53 = vadd.f32 %v1092_v49, %v1074_v4 }
 0x111   : > { %v2328_v51 = vadd.f32 %v1147_v41, %v1129_v33  ;;  %v1112_v56 = vadd.f32 %v1111_v50, %v1093_v53 }
 0x113   : > { %vm1159_vm10 = vcmp.ge.f32.partialorder %v2328_v51, 0.0  ;;  %v1168_v54 = vmul.f32 %v2294_v5, %v2328_v51 }
 0x115   : > { %v1176_v55 = vsel %vm1159_vm10, %v2328_v51, %v1168_v54 }
 0x116   : > { %v1130_v25 = vpop.f32.mrf.mxu2  ;;  %v1095_v57 = vpop.f32.mrf.mxu0 }
 0x117   : > { %v1149_v52 = vpop.f32.mrf.mxu3  ;;  %v1131_v34 = vadd.f32 %v1130_v25, %v1112_v56  ;;  %v1096_v16 = vadd.f32 %v1095_v57, %v1077_v9  ;;  %v1114_v59 = vpop.f32.mrf.mxu1 }
 0x119   : > { %v2334_v58 = vadd.f32 %v1149_v52, %v1131_v34  ;;  %v1115_v62 = vadd.f32 %v1114_v59, %v1096_v16 }
 0x11b   : > { %vm1161_vm11 = vcmp.ge.f32.partialorder %v2334_v58, 0.0  ;;  %v1170_v60 = vmul.f32 %v2294_v5, %v2334_v58 }
 0x11d   : > { %v1178_v61 = vsel %vm1161_vm11, %v2334_v58, %v1170_v60 }
 0x11e   : > { %v1133_v2 = vpop.f32.mrf.mxu2  ;;  %v1097_v63 = vpop.f32.mrf.mxu0 }
 0x11f   : > { %v1152_v3 = vpop.f32.mrf.mxu3  ;;  %v1134_v26 = vadd.f32 %v1133_v2, %v1115_v62  ;;  %v1098_v6 = vadd.f32 %v1097_v63, %v1079_v0  ;;  %v1116_v1 = vpop.f32.mrf.mxu1 }
 0x121   : > { %v2340_v20 = vadd.f32 %v1152_v3, %v1134_v26  ;;  %v1117_v10 = vadd.f32 %v1116_v1, %v1098_v6 }
 0x123   : > { %vm1163_vm12 = vcmp.ge.f32.partialorder %v2340_v20, 0.0  ;;  %v1172_v27 = vmul.f32 %v2294_v5, %v2340_v20 }
 0x125   : > { %v1180_v8 = vsel %vm1163_vm12, %v2340_v20, %v1172_v27 }
 0x126   : > { %v1135_v14 = vpop.f32.mrf.mxu2 }
 0x127   : > { %v1136_v15 = vadd.f32 %v1135_v14, %v1117_v10  ;;  %v1154_v39 = vpop.f32.mrf.mxu3 }
 0x129   : > { %v2346_v18 = vadd.f32 %v1154_v39, %v1136_v15  ;;  %1202 = sbr.rel (%p2289_p12) target bundleno = 310 (0x136), region = 44 }
 0x12b   : > { %vm1165_vm13 = vcmp.ge.f32.partialorder %v2346_v18, 0.0  ;;  %v1174_v21 = vmul.f32 %v2294_v5, %v2346_v18 }
 0x12d   : > { %v1182_v22 = vsel %vm1165_vm13, %v2346_v18, %v1174_v21 }
 0x12e   : > { %1203 = vst [vmem:[#allocation2 + $0x30] sm:$0xff] %v2302_v35 }
 0x12f   : > { %1204 = vst [vmem:[#allocation2] sm:$0xff] %v1176_v55 }
 0x130   : > { %1205 = vst [vmem:[#allocation2 + $0x18] sm:$0xff] %v2310_v11 }
 0x131   : > { %1206 = vst [vmem:[#allocation2 + $0x10] sm:$0xff] %v1178_v61 }
 0x132   : > { %1207 = vst [vmem:[#allocation2 + $0x8] sm:$0xff] %v2318_v30 }
 0x133   : > { %1208 = vst [vmem:[#allocation2 + $0x20] sm:$0xff] %v1180_v8 }
 0x134   : > { %1209 = vst [vmem:[#allocation2 + $0x28] sm:$0xff] %v2326_v44 }
 0x135   : > { %1210 = vst [vmem:[#allocation2 + $0x38] sm:$0xff] %v1182_v22 }
 0x136 PF: > { %1213 = sbr.rel (%p1198_p11) target bundleno = 334 (0x14e), region = 48 }
 0x13b   : > { %v1214_v5 = vld [vmem:[#allocation3] sm:$0xff]  ;;  %v1215_v23 = vld [vmem:[#allocation3 + $0x18] sm:$0xff]  ;;  %v1216_v29 = vld [vmem:[#allocation3 + $0x10] sm:$0xff] }
 0x13c   : > { %v1222_v47 = vadd.f32 %v1214_v5, %v2302_v35  ;;  %v1223_v37 = vadd.f32 %v1215_v23, %v1176_v55  ;;  %v1217_v38 = vld [vmem:[#allocation3 + $0x20] sm:$0xff]  ;;  %v1224_v42 = vadd.f32 %v1216_v29, %v2310_v11  ;;  %v1218_v7 = vld [vmem:[#allocation3 + $0x28] sm:$0xff]  ;;  %v1220_v40 = vld [vmem:[#allocation3 + $0x30] sm:$0xff] }
 0x13d   : > { %v1225_v12 = vadd.f32 %v1217_v38, %v1178_v61  ;;  %v1219_v31 = vld [vmem:[#allocation3 + $0x8] sm:$0xff]  ;;  %v1226_v45 = vadd.f32 %v1218_v7, %v2318_v30  ;;  %v1221_v35 = vld [vmem:[#allocation3 + $0x38] sm:$0xff]  ;;  %v1228_v24 = vadd.f32 %v1220_v40, %v2326_v44 }
 0x13e   : > { %1230 = vst [vmem:[#allocation2 + $0x30] sm:$0xff] %v1222_v47  ;;  %v1227_v48 = vadd.f32 %v1219_v31, %v1180_v8  ;;  %v1229_v11 = vadd.f32 %v1221_v35, %v1182_v22 }
 0x13f   : > { %1238 = vst [vmem:[#allocation3] sm:$0xff] %v1222_v47 }
 0x140   : > { %1231 = vst [vmem:[#allocation2] sm:$0xff] %v1223_v37 }
 0x141   : > { %1239 = vst [vmem:[#allocation3 + $0x18] sm:$0xff] %v1223_v37 }
 0x142   : > { %1232 = vst [vmem:[#allocation2 + $0x18] sm:$0xff] %v1224_v42 }
 0x143   : > { %1240 = vst [vmem:[#allocation3 + $0x10] sm:$0xff] %v1224_v42 }
 0x144   : > { %1233 = vst [vmem:[#allocation2 + $0x10] sm:$0xff] %v1225_v12 }
 0x145   : > { %1241 = vst [vmem:[#allocation3 + $0x20] sm:$0xff] %v1225_v12 }
 0x146   : > { %1234 = vst [vmem:[#allocation2 + $0x8] sm:$0xff] %v1226_v45 }
 0x147   : > { %1242 = vst [vmem:[#allocation3 + $0x28] sm:$0xff] %v1226_v45 }
 0x148   : > { %1235 = vst [vmem:[#allocation2 + $0x20] sm:$0xff] %v1227_v48 }
 0x149   : > { %1243 = vst [vmem:[#allocation3 + $0x8] sm:$0xff] %v1227_v48 }
 0x14a   : > { %1236 = vst [vmem:[#allocation2 + $0x28] sm:$0xff] %v1228_v24 }
 0x14b   : > { %1244 = vst [vmem:[#allocation3 + $0x30] sm:$0xff] %v1228_v24 }
 0x14c   : > { %1237 = vst [vmem:[#allocation2 + $0x38] sm:$0xff] %v1229_v11 }
 0x14d   : > { %1245 = vst [vmem:[#allocation3 + $0x38] sm:$0xff] %v1229_v11 }
 0x14e PF: > { %1248 = sbr.rel (%p1197_p10) target bundleno = 350 (0x15e), region = 52 }
 0x153   : > { %v1249_v30 = vld [vmem:[%s2425_s0] sm:$0xff]  ;;  %v1250_v44 = vld [vmem:[%s2425_s0 + $0x8] sm:$0xff]  ;;  %v1251_v32 = vld [vmem:[%s2425_s0 + $0x10] sm:$0xff] }
 0x154   : > { %v1257_v13 = vadd.f32 %v1249_v30, %v2296_v19  ;;  %v1258_v17 = vadd.f32 %v1250_v44, %v2328_v51  ;;  %v1259_v36 = vadd.f32 %v1251_v32, %v2304_v46  ;;  %v1252_v41 = vld [vmem:[%s2425_s0 + $0x18] sm:$0xff]  ;;  %v1253_v4 = vld [vmem:[%s2425_s0 + $0x20] sm:$0xff]  ;;  %v1254_v33 = vld [vmem:[%s2425_s0 + $0x28] sm:$0xff] }
 0x155   : > { %v1260_v49 = vadd.f32 %v1252_v41, %v2334_v58  ;;  %v1255_v19 = vld [vmem:[%s2425_s0 + $0x30] sm:$0xff]  ;;  %v1261_v46 = vadd.f32 %v1253_v4, %v2312_v28  ;;  %v1256_v50 = vld [vmem:[%s2425_s0 + $0x38] sm:$0xff]  ;;  %v1262_v51 = vadd.f32 %v1254_v33, %v2340_v20 }
 0x156   : > { %1265 = vst [vmem:[%s2428_s3] sm:$0xff] %v1257_v13  ;;  %v1263_v53 = vadd.f32 %v1255_v19, %v2320_v43  ;;  %v1264_v28 = vadd.f32 %v1256_v50, %v2346_v18 }
 0x157   : > { %1266 = vst [vmem:[%s2428_s3 + $0x8] sm:$0xff] %v1258_v17 }
 0x158   : > { %1267 = vst [vmem:[%s2428_s3 + $0x10] sm:$0xff] %v1259_v36 }
 0x159   : > { %1268 = vst [vmem:[%s2428_s3 + $0x18] sm:$0xff] %v1260_v49 }
 0x15a   : > { %1269 = vst [vmem:[%s2428_s3 + $0x20] sm:$0xff] %v1261_v46 }
 0x15b   : > { %1270 = vst [vmem:[%s2428_s3 + $0x28] sm:$0xff] %v1262_v51 }
 0x15c   : > { %1271 = vst [vmem:[%s2428_s3 + $0x30] sm:$0xff] %v1263_v53 }
 0x15d   : > { %1272 = vst [vmem:[%s2428_s3 + $0x38] sm:$0xff] %v1264_v28 }
 0x15e PF: > { %s14_s12 = sadd.s32 1, %s1858_s12  }
 0x15f   : > { %p11_p13 = scmp.ge.s32.totalorder %s14_s12, 11  }
 0x161   :  { %13 = sbr.rel (!%p11_p13) target bundleno = 1 (0x1), region = 79 }
 0x166   :  { %1284 = vsyncpa [#allocation5], 1 }
 0x167   :  { %1286 = vsyncpa [#allocation5 + $0x1], 1 }

</bundles_post_ra>
